<compile_context>
chip_gen: v7x
topology: tpu7x:2x2x1
jax: 0.10.0
libtpu: 0.0.40
codegen_flags: <defaults>
</compile_context>

<pallas_src>
import functools

import jax
import jax.numpy as jnp
from jax.experimental import pallas as pl
from jax.experimental.pallas import tpu as pltpu


def _round_up(x, m):
    return (x + m - 1) // m * m


# ----------------------------------------------------------------------------- kernels


def _linear_partial_stats_kernel(x_ref, w_ref, sums_ref, sumsqs_ref):
    """Pass 1 (BN path): y = x @ W for this row tile; emit per-tile partial
    sum / sum-of-squares into row 0 of an (8, F) block (rows 1..7 zero).
    y is NOT written back to HBM — it is recomputed in pass 2."""
    y = jnp.dot(x_ref[...], w_ref[...], preferred_element_type=jnp.float32)
    psum = jnp.sum(y, axis=0, keepdims=True)          # (1, F)
    psumsq = jnp.sum(y * y, axis=0, keepdims=True)    # (1, F)
    row = jax.lax.broadcasted_iota(jnp.int32, sums_ref.shape, 0)
    sums_ref[...] = jnp.where(row == 0, psum, 0.0)
    sumsqs_ref[...] = jnp.where(row == 0, psumsq, 0.0)


def _linear_bn_apply_kernel(x_ref, w_ref, gamma_ref, beta_ref, sums_ref, sumsqs_ref,
                            o_ref, *, inv_n, eps, use_relu, tile_n, n_valid, mask_rows):
    """Pass 2 (BN path): recompute y = x @ W, fold the batch statistics into a single
    per-feature (scale, shift), apply (+ ReLU), zero padded rows, store in out dtype.

    The reduction of the tiny (num_tiles*8, F) partials is redone every grid step so
    the row-tile axis stays fully 'parallel' (v7x two-core friendly); the cost is a
    few KB of VPU/XLU work per step."""
    y = jnp.dot(x_ref[...], w_ref[...], preferred_element_type=jnp.float32)

    # Padded rows of x are exactly zero and the linear bias is omitted pre-BN
    # (BatchNorm's mean subtraction cancels it), so padded rows contribute 0 to the
    # partial sums and inv_n = 1 / true_N gives exact batch statistics.
    mean = jnp.sum(sums_ref[...], axis=0, keepdims=True) * inv_n
    # TODO(synk): E[y^2] - E[y]^2 in f32 can cancel for extremely large batches /
    # large-magnitude activations; switch to a centered second pass if that matters.
    var = jnp.maximum(
        jnp.sum(sumsqs_ref[...], axis=0, keepdims=True) * inv_n - mean * mean, 0.0)
    scale = gamma_ref[...] * jax.lax.rsqrt(var + eps)
    shift = beta_ref[...] - mean * scale

    y = y * scale + shift
    if use_relu:
        y = jnp.maximum(y, 0.0)
    if mask_rows:
        # Keep padded rows exactly zero so chained (row-padded) layers keep exact
        # batch statistics.
        row = jax.lax.broadcasted_iota(jnp.int32, y.shape, 0) + pl.program_id(0) * tile_n
        y = jnp.where(row < n_valid, y, 0.0)
    o_ref[...] = y.astype(o_ref.dtype)


def _linear_act_kernel(x_ref, w_ref, b_ref, o_ref, *, add_bias, use_relu,
                       tile_n, n_valid, mask_rows):
    """No-BatchNorm path: out = x @ W (+ b) (+ ReLU), tiled over rows."""
    y = jnp.dot(x_ref[...], w_ref[...], preferred_element_type=jnp.float32)
    if add_bias:
        y = y + b_ref[...]
    if use_relu:
        y = jnp.maximum(y, 0.0)
    if mask_rows:
        row = jax.lax.broadcasted_iota(jnp.int32, y.shape, 0) + pl.program_id(0) * tile_n
        y = jnp.where(row < n_valid, y, 0.0)
    o_ref[...] = y.astype(o_ref.dtype)


# ----------------------------------------------------------------------------- wrapper


def linear_bn(x, w, b=None, gamma=None, beta=None, *, do_batchnorm=True,
              activation=None, eps=1e-5, tile_n=1024, n_valid=None):
    """LinearBn forward: act(BN(x @ W (+ b))).

    x: (N_phys, K) — may already be row-padded (padded rows must be zero); w: (K, F)
    (torch weight transposed); b / gamma / beta: (1, F).  `n_valid` is the true number
    of rows (defaults to N_phys).  BatchNorm1d is evaluated in training mode (batch
    statistics over the valid rows, biased variance).

    Returns the ROW-PADDED output (n_pad, F) with padded rows zeroed; slice to
    (n_valid, F) after the last layer of a stack.
    """
    N_phys, K = x.shape
    Kw, F = w.shape
    assert Kw == K, (Kw, K)
    n_valid = N_phys if n_valid is None else int(n_valid)
    assert 0 < n_valid <= N_phys, (n_valid, N_phys)
    use_relu = (activation == "relu")

    itemsize = jnp.dtype(x.dtype).itemsize

    # Row tiling: big tiles (good pipelining / fewer grid steps), clamped so the
    # double-buffered working set stays small even on v7x's 64 MiB VMEM.
    per_row = 2 * K * itemsize + 2 * F * max(itemsize, 4) + F * 4
    tile_n = min(int(tile_n), max(8, ((6 << 20) // max(per_row, 1)) // 8 * 8))
    if N_phys <= tile_n:
        tile_n = _round_up(max(N_phys, 8), 8)
    n_pad = _round_up(N_phys, tile_n)
    num_tiles = n_pad // tile_n
    mask_rows = n_pad > n_valid

    # Only the row axis is ever padded; feature dims stay at their natural size
    # (BlockSpec dims equal to the full array dims are legal).
    xp = jnp.pad(x, ((0, n_pad - N_phys), (0, 0))) if n_pad != N_phys else x

    # VMEM budget from the actual (double-buffered) tiles, capped below v7x's 64 MiB.
    est = (2 * tile_n * K * itemsize            # x tiles (x2 buffers)
           + 2 * K * F * itemsize               # resident W
           + 2 * tile_n * F * max(itemsize, 4)  # out tiles
           + tile_n * F * 4                     # f32 y temporaries
           + 4 * num_tiles * 8 * F * 4          # partial-stat blocks
           + 8 * F * 4)                         # per-feature vectors
    vmem_limit = int(min(max(2 * est + (4 << 20), 16 << 20), 40 << 20))

    if do_batchnorm:
        gamma_p = gamma.astype(jnp.float32)
        beta_p = beta.astype(jnp.float32)

        # Pass 1: per-tile partial batch statistics (no y materialization).
        sums, sumsqs = pl.pallas_call(
            _linear_partial_stats_kernel,
            out_shape=(
                jax.ShapeDtypeStruct((num_tiles * 8, F), jnp.float32),
                jax.ShapeDtypeStruct((num_tiles * 8, F), jnp.float32),
            ),
            grid_spec=pltpu.PrefetchScalarGridSpec(
                num_scalar_prefetch=0,
                grid=(num_tiles,),
                in_specs=[
                    pl.BlockSpec((tile_n, K), lambda i: (i, 0)),
                    pl.BlockSpec((K, F), lambda i: (0, 0)),
                ],
                out_specs=[
                    pl.BlockSpec((8, F), lambda i: (i, 0)),
                    pl.BlockSpec((8, F), lambda i: (i, 0)),
                ],
            ),
            compiler_params=pltpu.CompilerParams(
                dimension_semantics=("parallel",),   # independent per tile (v7x 2-TC)
                vmem_limit_bytes=vmem_limit,
            ),
        )(xp, w)

        # Pass 2: recompute x @ W, fold stats into (scale, shift), apply + ReLU.
        out_p = pl.pallas_call(
            functools.partial(_linear_bn_apply_kernel,
                              inv_n=1.0 / float(n_valid), eps=float(eps),
                              use_relu=use_relu, tile_n=tile_n, n_valid=n_valid,
                              mask_rows=mask_rows),
            out_shape=jax.ShapeDtypeStruct((n_pad, F), x.dtype),
            grid_spec=pltpu.PrefetchScalarGridSpec(
                num_scalar_prefetch=0,
                grid=(num_tiles,),
                in_specs=[
                    pl.BlockSpec((tile_n, K), lambda i: (i, 0)),
                    pl.BlockSpec((K, F), lambda i: (0, 0)),
                    pl.BlockSpec((1, F), lambda i: (0, 0)),
                    pl.BlockSpec((1, F), lambda i: (0, 0)),
                    pl.BlockSpec((num_tiles * 8, F), lambda i: (0, 0)),
                    pl.BlockSpec((num_tiles * 8, F), lambda i: (0, 0)),
                ],
                out_specs=pl.BlockSpec((tile_n, F), lambda i: (i, 0)),
            ),
            compiler_params=pltpu.CompilerParams(
                dimension_semantics=("parallel",),
                vmem_limit_bytes=vmem_limit,
            ),
        )(xp, w, gamma_p, beta_p, sums, sumsqs)
    else:
        if b is not None:
            bp = b.astype(jnp.float32)
        else:
            bp = jnp.zeros((1, F), jnp.float32)
        out_p = pl.pallas_call(
            functools.partial(_linear_act_kernel,
                              add_bias=(b is not None), use_relu=use_relu,
                              tile_n=tile_n, n_valid=n_valid, mask_rows=mask_rows),
            out_shape=jax.ShapeDtypeStruct((n_pad, F), x.dtype),
            grid_spec=pltpu.PrefetchScalarGridSpec(
                num_scalar_prefetch=0,
                grid=(num_tiles,),
                in_specs=[
                    pl.BlockSpec((tile_n, K), lambda i: (i, 0)),
                    pl.BlockSpec((K, F), lambda i: (0, 0)),
                    pl.BlockSpec((1, F), lambda i: (0, 0)),
                ],
                out_specs=pl.BlockSpec((tile_n, F), lambda i: (i, 0)),
            ),
            compiler_params=pltpu.CompilerParams(
                dimension_semantics=("parallel",),
                vmem_limit_bytes=vmem_limit,
            ),
        )(xp, w, bp)

    return out_p   # row-padded; caller slices to (n_valid, F) after the last layer


# --------------------------------------------------------------------------- reference


def _reference_linear_bn(x, w, b, gamma, beta, *, do_batchnorm, activation, eps=1e-5):
    """Pure-JAX reference with full PyTorch semantics (bias included before BN)."""
    y = x @ w
    if b is not None:
        y = y + b
    if do_batchnorm:
        mean = jnp.mean(y, axis=0, keepdims=True)
        var = jnp.mean((y - mean) ** 2, axis=0, keepdims=True)   # biased, like PyTorch
        y = (y - mean) * jax.lax.rsqrt(var + eps) * gamma + beta
    if activation == "relu":
        y = jnp.maximum(y, 0.0)
    return y


# -------------------------------------------------------------------------------- demo


if __name__ == "__main__":
    key = jax.random.PRNGKey(0)

    # Shapes implied by VanillaMPNN defaults: node_in_feats=32,
    # node_hidden_feats=[64, 128], ntasks=1, readout_type="node".
    num_nodes = 300            # non-multiple of 8 -> exercises row padding + masking
    node_in, h1, h2, ntasks = 32, 64, 128, 1

    key, kx = jax.random.split(key)
    node_feats = jax.random.normal(kx, (num_nodes, node_in), dtype=jnp.float32)

    def init_linear(k, fan_in, fan_out):
        kw, kb = jax.random.split(k)
        bound = 1.0 / (fan_in ** 0.5)
        w = jax.random.uniform(kw, (fan_in, fan_out), jnp.float32, -bound, bound)
        b = jax.random.uniform(kb, (1, fan_out), jnp.float32, -bound, bound)
        gamma = jnp.ones((1, fan_out), jnp.float32)   # BN weight init
        beta = jnp.zeros((1, fan_out), jnp.float32)   # BN bias init
        return w, b, gamma, beta

    # (in, out, do_batchnorm, activation): preprocess stack + node-readout predict head.
    layer_cfg = [
        (node_in, h1, True, "relu"),   # preprocess LinearBn(32 -> 64)  + ReLU
        (h1, h2, True, "relu"),        # preprocess LinearBn(64 -> 128) + ReLU
        (h2, h2, True, "relu"),        # predict    LinearBn(128 -> 128) + ReLU
        (h2, ntasks, False, None),     # predict    final nn.Linear(128 -> 1)
    ]
    params = []
    for (fi, fo, _, _) in layer_cfg:
        key, kl = jax.random.split(key)
        params.append(init_linear(kl, fi, fo))

    # TODO(synk): VanillaMPNN's NNConv edge-conditioned message passing, GRU update
    # loop and Set2Set readout involve data-dependent graph gather/scatter and a
    # recurrence; they are not translated to Pallas here.

    # Pallas path: activations stay row-padded across layers (padded rows kept at
    # exactly zero by the kernels); slice to (num_nodes, ntasks) once at the end.
    out = node_feats
    ref = node_feats
    for (fi, fo, do_bn, act), (w, b, g, bt) in zip(layer_cfg, params):
        out = linear_bn(out, w, b, g, bt, do_batchnorm=do_bn, activation=act,
                        n_valid=num_nodes)
        ref = _reference_linear_bn(ref, w, b, g, bt,
                                   do_batchnorm=do_bn, activation=act)
    out = out[:num_nodes, :]

    out = jax.block_until_ready(out)
    ref = jax.block_until_ready(ref)

    assert out.shape == (num_nodes, ntasks), out.shape
    assert bool(jnp.all(jnp.isfinite(out)))
    max_err = float(jnp.max(jnp.abs(out - ref)))
    assert jnp.allclose(out, ref, atol=2e-3, rtol=2e-3), f"mismatch vs reference: {max_err}"

    print("KERNEL_OK")
</pallas_src>

<mosaic_0001>
module attributes {stable_mosaic.version = 11 : i64} {
  func.func @_linear_partial_stats_kernel(%arg0: i32, %arg1: memref<304x32xf32, #tpu.memory_space<vmem>>, %arg2: memref<32x64xf32, #tpu.memory_space<vmem>>, %arg3: memref<8x64xf32, #tpu.memory_space<vmem>>, %arg4: memref<8x64xf32, #tpu.memory_space<vmem>>) attributes {dimension_semantics = [#tpu.dimension_semantics<parallel>], iteration_bounds = array<i64: 1>, scalar_prefetch = 0 : i64, scratch_operands = 0 : i64, tpu.core_type = #tpu.core_type<tc>, window_params = [{transform_indices = @transform_0, window_bounds = array<i64: 304, 32>}, {pipeline_mode = #tpu.pipeline_mode<synchronous>, transform_indices = @transform_1, window_bounds = array<i64: 32, 64>}, {transform_indices = @transform_2, window_bounds = array<i64: 8, 64>}, {transform_indices = @transform_3, window_bounds = array<i64: 8, 64>}]} {
    %c0 = arith.constant 0 : index
    %c0_0 = arith.constant 0 : index
    %0 = vector.load %arg1[%c0, %c0_0] : memref<304x32xf32, #tpu.memory_space<vmem>>, vector<304x32xf32>
    %c0_1 = arith.constant 0 : index
    %c0_2 = arith.constant 0 : index
    %1 = vector.load %arg2[%c0_1, %c0_2] : memref<32x64xf32, #tpu.memory_space<vmem>>, vector<32x64xf32>
    %cst = arith.constant dense<0.000000e+00> : vector<304x64xf32>
    %2 = tpu.matmul %0, %1, %cst {dimension_numbers = #tpu.dot_dimension_numbers<[1], [0], [0], [1], [0, 0, 1, 1], [], []>} : vector<304x32xf32>, vector<32x64xf32>, vector<304x64xf32> -> vector<304x64xf32>
    %cst_3 = arith.constant dense<0.000000e+00> : vector<64xf32>
    %3 = vector.multi_reduction <add>, %2, %cst_3 [0] : vector<304x64xf32> to vector<64xf32>
    %4 = vector.shape_cast %3 : vector<64xf32> to vector<1x64xf32>
    %5 = arith.mulf %2, %2 : vector<304x64xf32>
    %cst_4 = arith.constant dense<0.000000e+00> : vector<64xf32>
    %6 = vector.multi_reduction <add>, %5, %cst_4 [0] : vector<304x64xf32> to vector<64xf32>
    %7 = vector.shape_cast %6 : vector<64xf32> to vector<1x64xf32>
    %8 = tpu.iota {dimensions = array<i32: 0>} : vector<8x64xi32>
    %c0_i32 = arith.constant 0 : i32
    %9 = vector.broadcast %c0_i32 : i32 to vector<8x64xi32>
    %10 = arith.cmpi eq, %8, %9 : vector<8x64xi32>
    %cst_5 = arith.constant 0.000000e+00 : f32
    %11 = vector.shape_cast %4 : vector<1x64xf32> to vector<1x64xf32>
    %12 = vector.broadcast %11 : vector<1x64xf32> to vector<8x64xf32>
    %13 = vector.broadcast %cst_5 : f32 to vector<8x64xf32>
    %14 = arith.select %10, %12, %13 : vector<8x64xi1>, vector<8x64xf32>
    %c0_6 = arith.constant 0 : index
    %c0_7 = arith.constant 0 : index
    %15 = vector.load %arg3[%c0_6, %c0_7] : memref<8x64xf32, #tpu.memory_space<vmem>>, vector<8x64xf32>
    tpu.vector_store %arg3[%c0_6, %c0_7], %14 {strides = array<i32>} : memref<8x64xf32, #tpu.memory_space<vmem>>, vector<8x64xf32>,
    %c0_i32_8 = arith.constant 0 : i32
    %16 = vector.broadcast %c0_i32_8 : i32 to vector<8x64xi32>
    %17 = arith.cmpi eq, %8, %16 : vector<8x64xi32>
    %cst_9 = arith.constant 0.000000e+00 : f32
    %18 = vector.shape_cast %7 : vector<1x64xf32> to vector<1x64xf32>
    %19 = vector.broadcast %18 : vector<1x64xf32> to vector<8x64xf32>
    %20 = vector.broadcast %cst_9 : f32 to vector<8x64xf32>
    %21 = arith.select %17, %19, %20 : vector<8x64xi1>, vector<8x64xf32>
    %c0_10 = arith.constant 0 : index
    %c0_11 = arith.constant 0 : index
    %22 = vector.load %arg4[%c0_10, %c0_11] : memref<8x64xf32, #tpu.memory_space<vmem>>, vector<8x64xf32>
    tpu.vector_store %arg4[%c0_10, %c0_11], %21 {strides = array<i32>} : memref<8x64xf32, #tpu.memory_space<vmem>>, vector<8x64xf32>,
    return
  }
  func.func @transform_0(%arg0: i32) -> (i32, i32) {
    %c0_i32 = arith.constant 0 : i32
    %c0_i32_0 = arith.constant 0 : i32
    return %arg0, %c0_i32 : i32, i32
  }
  func.func @transform_1(%arg0: i32) -> (i32, i32) {
    %c0_i32 = arith.constant 0 : i32
    %c0_i32_0 = arith.constant 0 : i32
    %c0_i32_1 = arith.constant 0 : i32
    return %c0_i32, %c0_i32_0 : i32, i32
  }
  func.func @transform_2(%arg0: i32) -> (i32, i32) {
    %c0_i32 = arith.constant 0 : i32
    %c0_i32_0 = arith.constant 0 : i32
    return %arg0, %c0_i32 : i32, i32
  }
  func.func @transform_3(%arg0: i32) -> (i32, i32) {
    %c0_i32 = arith.constant 0 : i32
    %c0_i32_0 = arith.constant 0 : i32
    return %arg0, %c0_i32 : i32, i32
  }
}

</mosaic_0001>

<bundles_post_ra>
// kernel: tpu_custom_call.1
= control target key start
LH: loop header
LB: loop body
LE: loop exit
PB: predicated region body
PF: predicated region fallthrough
CT: control target
= control target key end

     0   :  { %9 = vsyncpa [#allocation3], 0  ;;  %vm57_vm0 = vcmask 261120   ;;  %s1250_s0 = inlined_call_operand.vmem [shape: f32[304,32], index: 0, kind: input, shape index: {}]   ;;  %s1251_s1 = inlined_call_operand.vmem [shape: f32[32,64], index: 1, kind: input, shape index: {}]   ;;  %s1252_s2 = inlined_call_operand.hbm [shape: f32[8,64], index: 2, kind: output, shape index: {0}]   ;;  %s1253_s3 = inlined_call_operand.hbm [shape: f32[8,64], index: 3, kind: output, shape index: {1}]  }
   0x1   :  { %v53_v0 = vld [vmem:[%s1251_s1] sm:$0xff]  ;;  %v54_v1 = vld [vmem:[%s1251_s1 + $0x8] sm:$0xff]  ;;  %v55_v2 = vld [vmem:[%s1251_s1 + $0x10] sm:$0xff] }
   0x2   :  { %v808_v3 = vpack.c.bf16 %v54_v1, %v53_v0  ;;  %v56_v4 = vld [vmem:[%s1251_s1 + $0x18] sm:$0xff]  ;;  %v15_v5 = vld [vmem:[%s1250_s0] sm:$0xff]  ;;  %v16_v7 = vld [vmem:[%s1250_s0 + $0x8] sm:$0xff] }
   0x3   :  { %v812_v6 = vpack.c.bf16 %v56_v4, %v55_v2  ;;  %751 = vmatprep.mubr.msk.f32.mxu0 %vm57_vm0, %v15_v5  ;;  %v35_v8 = vld [vmem:[%s1250_s0 + $0xa0] sm:$0xff]  ;;  %v36_v9 = vld [vmem:[%s1250_s0 + $0xa8] sm:$0xff]  ;;  %v17_v10 = vld [vmem:[%s1250_s0 + $0x10] sm:$0xff] }
   0x4   :  { %809 = vmatprep.subr.bf16.mxu0 %v808_v3  ;;  %816 = vmatprep.subr.bf16.mxu1 %v808_v3  ;;  %v37_v11 = vld [vmem:[%s1250_s0 + $0xb0] sm:$0xff]  ;;  %v18_v12 = vld [vmem:[%s1250_s0 + $0x18] sm:$0xff]  ;;  %v19_v14 = vld [vmem:[%s1250_s0 + $0x20] sm:$0xff] }
   0x5   :  { %811 = vmatpush3.bf16.msra.mxu0 %v808_v3  ;;  %818 = vmatpush3.bf16.msra.mxu1 %v808_v3  ;;  %v38_v13 = vld [vmem:[%s1250_s0 + $0xb8] sm:$0xff]  ;;  %v39_v15 = vld [vmem:[%s1250_s0 + $0xc0] sm:$0xff] }
   0x6   :  { %813 = vmatprep.subr.bf16.mxu0 %v812_v6  ;;  %817 = vmatprep.subr.bf16.mxu1 %v812_v6 }
   0x7   :  { %781 = vmatprep.mubr.msk.f32.mxu1 %vm57_vm0, %v35_v8 }
   0x9   :  { %815 = vmatpush3.bf16.msra.mxu0 %v812_v6  ;;  %819 = vmatpush3.bf16.msra.mxu1 %v812_v6 }
   0xc   :  { %752 = vmatmul.mubr.msk.f32.vlgmr.msra.gmra.mrb[0].mxu0 %vm57_vm0, %v16_v7  ;;  %782 = vmatmul.mubr.msk.f32.vlgmr.msra.gmra.mrb[0].mxu1 %vm57_vm0, %v36_v9 }
   0xd   :  { %754 = vmatprep.mubr.msk.f32.mxu0 %vm57_vm0, %v17_v10  ;;  %784 = vmatprep.mubr.msk.f32.mxu1 %vm57_vm0, %v37_v11 }
   0xe   :  { %10 = vsyncpa [#allocation5], 0  ;;  %v20_v16 = vld [vmem:[%s1250_s0 + $0x28] sm:$0xff]  ;;  %v21_v18 = vld [vmem:[%s1250_s0 + $0x30] sm:$0xff]  ;;  %vm427_vm1 = vcmask 523264   ;;  %s871_s13 = smov [#allocation4]  }
   0xf   :  { %v40_v17 = vld [vmem:[%s1250_s0 + $0xc8] sm:$0xff]  ;;  %v41_v19 = vld [vmem:[%s1250_s0 + $0xd0] sm:$0xff]  ;;  %v22_v20 = vld [vmem:[%s1250_s0 + $0x38] sm:$0xff]  ;;  %s651_s14 = sshll.u32 %s871_s13, 4  ;;  %s652_s14 = int_to_ptr.vmem [resolvable:$true] %s651_s14 }
  0x10   :  { %755 = vmatmul.mubr.msk.f32.gmra.mrb[2].mxu0 %vm57_vm0, %v18_v12  ;;  %785 = vmatmul.mubr.msk.f32.gmra.mrb[2].mxu1 %vm57_vm0, %v38_v13  ;;  %v42_v21 = vld [vmem:[%s1250_s0 + $0xd8] sm:$0xff]  ;;  %v23_v22 = vld [vmem:[%s1250_s0 + $0x40] sm:$0xff]  ;;  %v24_v24 = vld [vmem:[%s1250_s0 + $0x48] sm:$0xff] }
  0x11   :  { %757 = vmatprep.mubr.msk.f32.mxu0 %vm57_vm0, %v19_v14  ;;  %787 = vmatprep.mubr.msk.f32.mxu1 %vm57_vm0, %v39_v15  ;;  %v43_v23 = vld [vmem:[%s1250_s0 + $0xe0] sm:$0xff]  ;;  %v44_v25 = vld [vmem:[%s1250_s0 + $0xe8] sm:$0xff]  ;;  %v25_v26 = vld [vmem:[%s1250_s0 + $0x50] sm:$0xff] }
  0x12   :  { %v45_v27 = vld [vmem:[%s1250_s0 + $0xf0] sm:$0xff]  ;;  %v26_v28 = vld [vmem:[%s1250_s0 + $0x58] sm:$0xff]  ;;  %v27_v30 = vld [vmem:[%s1250_s0 + $0x60] sm:$0xff] }
  0x13   :  { %v46_v29 = vld [vmem:[%s1250_s0 + $0xf8] sm:$0xff]  ;;  %v47_v31 = vld [vmem:[%s1250_s0 + $0x100] sm:$0xff]  ;;  %v28_v32 = vld [vmem:[%s1250_s0 + $0x68] sm:$0xff] }
  0x14   :  { %758 = vmatmul.mubr.msk.f32.gmra.mrb[4].mxu0 %vm57_vm0, %v20_v16  ;;  %788 = vmatmul.mubr.msk.f32.gmra.mrb[4].mxu1 %vm57_vm0, %v40_v17  ;;  %v48_v33 = vld [vmem:[%s1250_s0 + $0x108] sm:$0xff]  ;;  %v29_v34 = vld [vmem:[%s1250_s0 + $0x70] sm:$0xff]  ;;  %v30_v36 = vld [vmem:[%s1250_s0 + $0x78] sm:$0xff] }
  0x15   :  { %760 = vmatprep.mubr.msk.f32.mxu0 %vm57_vm0, %v21_v18  ;;  %790 = vmatprep.mubr.msk.f32.mxu1 %vm57_vm0, %v41_v19  ;;  %v49_v35 = vld [vmem:[%s1250_s0 + $0x110] sm:$0xff]  ;;  %v50_v37 = vld [vmem:[%s1250_s0 + $0x118] sm:$0xff]  ;;  %v31_v38 = vld [vmem:[%s1250_s0 + $0x80] sm:$0xff] }
  0x16   :  { %v51_v39 = vld [vmem:[%s1250_s0 + $0x120] sm:$0xff]  ;;  %v32_v40 = vld [vmem:[%s1250_s0 + $0x88] sm:$0xff]  ;;  %v33_v42 = vld [vmem:[%s1250_s0 + $0x90] sm:$0xff] }
  0x17   :  { %v52_v41 = vld [vmem:[%s1250_s0 + $0x128] sm:$0xff]  ;;  %v34_v43 = vld [vmem:[%s1250_s0 + $0x98] sm:$0xff]  ;;  %s870_s0 = smov [#allocation2]  }
  0x18   :  { %761 = vmatmul.mubr.msk.f32.gmra.mrb[6].mxu0 %vm57_vm0, %v22_v20  ;;  %791 = vmatmul.mubr.msk.f32.gmra.mrb[6].mxu1 %vm57_vm0, %v42_v21  ;;  %s641_s12 = sshll.u32 %s870_s0, 4  ;;  %s642_s12 = int_to_ptr.vmem [resolvable:$true] %s641_s12 }
  0x19   :  { %763 = vmatprep.mubr.msk.f32.mxu0 %vm57_vm0, %v23_v22  ;;  %793 = vmatprep.mubr.msk.f32.mxu1 %vm57_vm0, %v43_v23  ;;  %s822_s15 = scalar_lea.vmem %s642_s12, 128  ;;  %p827_p1 = scmp.lt.s32.totalorder %s642_s12, %s642_s12 }
  0x1a   :  { %p823_p0 = scmp.ne.s32.totalorder %s642_s12, %s822_s15  ;;  %p828_p2 = scmp.lt.s32.totalorder %s822_s15, %s822_s15 }
  0x1c   :  { %764 = vmatmul.mubr.msk.f32.gmra.mrb[8].mxu0 %vm57_vm0, %v24_v24  ;;  %794 = vmatmul.mubr.msk.f32.gmra.mrb[8].mxu1 %vm57_vm0, %v44_v25  ;;  %p829_p3 = por %p828_p2, %p827_p1 }
  0x1d   :  { %766 = vmatprep.mubr.msk.f32.mxu0 %vm57_vm0, %v25_v26  ;;  %796 = vmatprep.mubr.msk.f32.mxu1 %vm57_vm0, %v45_v27 }
  0x1e   :  { %p830_p4 = pnand %p829_p3, %p823_p0 }
  0x20   :  { %767 = vmatmul.mubr.msk.f32.gmra.mrb[10].mxu0 %vm57_vm0, %v26_v28  ;;  %797 = vmatmul.mubr.msk.f32.gmra.mrb[10].mxu1 %vm57_vm0, %v46_v29 }
  0x21   :  { %769 = vmatprep.mubr.msk.f32.mxu0 %vm57_vm0, %v27_v30  ;;  %799 = vmatprep.mubr.msk.f32.mxu1 %vm57_vm0, %v47_v31 }
  0x24   :  { %770 = vmatmul.mubr.msk.f32.gmra.mrb[12].mxu0 %vm57_vm0, %v28_v32  ;;  %800 = vmatmul.mubr.msk.f32.gmra.mrb[12].mxu1 %vm57_vm0, %v48_v33 }
  0x25   :  { %772 = vmatprep.mubr.msk.f32.mxu0 %vm57_vm0, %v29_v34  ;;  %802 = vmatprep.mubr.msk.f32.mxu1 %vm57_vm0, %v49_v35 }
  0x28   :  { %773 = vmatmul.mubr.msk.f32.gmra.mrb[14].mxu0 %vm57_vm0, %v30_v36  ;;  %803 = vmatmul.mubr.msk.f32.gmra.mrb[14].mxu1 %vm57_vm0, %v50_v37 }
  0x29   :  { %775 = vmatprep.mubr.msk.f32.mxu0 %vm57_vm0, %v31_v38  ;;  %805 = vmatprep.mubr.msk.f32.mxu1 %vm57_vm0, %v51_v39 }
  0x2c   :  { %776 = vmatmul.mubr.msk.f32.gmra.mrb[16].mxu0 %vm57_vm0, %v32_v40  ;;  %806 = vmatmul.mubr.msk.f32.gmra.mrb[16].mxu1 %vm57_vm0, %v52_v41 }
  0x2d   :  { %778 = vmatprep.mubr.msk.f32.mxu0 %vm57_vm0, %v33_v42 }
  0x30   :  { %779 = vmatmul.mubr.msk.f32.gmra.mrb[18].mxu0 %vm57_vm0, %v34_v43 }
  0xdf   :  { %v753_v44 = vpop.f32.mrb[0].mxu0  ;;  %v1056_v45 = vpop.f32.mrb[0].mxu1 }
  0xe0   :  { %v429_v46 = vsel %vm427_vm1, %v753_v44, 0.0  ;;  %v510_v47 = vmul.f32 %v753_v44, %v753_v44  ;;  %v238_v48 = vpop.f32.mrb[1].mxu0  ;;  %v1059_v49 = vpop.f32.mrb[1].mxu1 }
  0xe1   :  { %v428_v50 = vsel %vm427_vm1, %v238_v48, 0.0  ;;  %v509_v51 = vmul.f32 %v238_v48, %v238_v48 }
  0xe2   :  { %v548_v52 = vsel %vm427_vm1, %v510_v47, 0.0  ;;  %v430_v53 = vadd.f32 %v429_v46, %v428_v50 }
  0xe3   :  { %v547_v54 = vsel %vm427_vm1, %v509_v51, 0.0  ;;  %v756_v55 = vpop.f32.mrb[2].mxu0  ;;  %v1064_v56 = vpop.f32.mrb[2].mxu1 }
  0xe4   :  { %v549_v57 = vadd.f32 %v548_v52, %v547_v54  ;;  %v248_v58 = vpop.f32.mrb[3].mxu0  ;;  %v1066_v59 = vpop.f32.mrb[3].mxu1  ;;  %v512_v60 = vmul.f32 %v756_v55, %v756_v55  ;;  %v433_v0 = vsel %vm427_vm1, %v756_v55, 0.0 }
  0xe5   :  { %v431_v61 = vsel %vm427_vm1, %v248_v58, 0.0  ;;  %v511_v62 = vmul.f32 %v248_v58, %v248_v58 }
  0xe6   :  { %v432_v63 = vadd.f32 %v431_v61, %v430_v53  ;;  %v552_v8 = vsel %vm427_vm1, %v512_v60, 0.0 }
  0xe7   :  { %v550_v1 = vsel %vm427_vm1, %v511_v62, 0.0  ;;  %v759_v2 = vpop.f32.mrb[4].mxu0  ;;  %v1071_v3 = vpop.f32.mrb[4].mxu1 }
  0xe8   :  { %v551_v4 = vadd.f32 %v550_v1, %v549_v57  ;;  %v258_v5 = vpop.f32.mrb[5].mxu0  ;;  %v434_v6 = vadd.f32 %v433_v0, %v432_v63  ;;  %v1073_v7 = vpop.f32.mrb[5].mxu1  ;;  %v514_v9 = vmul.f32 %v759_v2, %v759_v2  ;;  %v437_v14 = vsel %vm427_vm1, %v759_v2, 0.0 }
  0xe9   :  { %v435_v10 = vsel %vm427_vm1, %v258_v5, 0.0  ;;  %v513_v11 = vmul.f32 %v258_v5, %v258_v5 }
  0xea   :  { %v436_v12 = vadd.f32 %v435_v10, %v434_v6  ;;  %v553_v13 = vadd.f32 %v552_v8, %v551_v4  ;;  %v556_v22 = vsel %vm427_vm1, %v514_v9, 0.0 }
  0xeb   :  { %v554_v15 = vsel %vm427_vm1, %v513_v11, 0.0  ;;  %v762_v16 = vpop.f32.mrb[6].mxu0  ;;  %v1079_v17 = vpop.f32.mrb[6].mxu1 }
  0xec   :  { %v555_v18 = vadd.f32 %v554_v15, %v553_v13  ;;  %v268_v19 = vpop.f32.mrb[7].mxu0  ;;  %v438_v20 = vadd.f32 %v437_v14, %v436_v12  ;;  %v1081_v21 = vpop.f32.mrb[7].mxu1  ;;  %v516_v23 = vmul.f32 %v762_v16, %v762_v16  ;;  %v441_v28 = vsel %vm427_vm1, %v762_v16, 0.0 }
  0xed   :  { %v439_v24 = vsel %vm427_vm1, %v268_v19, 0.0  ;;  %v515_v25 = vmul.f32 %v268_v19, %v268_v19 }
  0xee   :  { %v440_v26 = vadd.f32 %v439_v24, %v438_v20  ;;  %v557_v27 = vadd.f32 %v556_v22, %v555_v18  ;;  %v560_v36 = vsel %vm427_vm1, %v516_v23, 0.0 }
  0xef   :  { %v558_v29 = vsel %vm427_vm1, %v515_v25, 0.0  ;;  %v765_v30 = vpop.f32.mrb[8].mxu0  ;;  %v1087_v31 = vpop.f32.mrb[8].mxu1 }
  0xf0   :  { %v559_v32 = vadd.f32 %v558_v29, %v557_v27  ;;  %v278_v33 = vpop.f32.mrb[9].mxu0  ;;  %v442_v34 = vadd.f32 %v441_v28, %v440_v26  ;;  %v1089_v35 = vpop.f32.mrb[9].mxu1  ;;  %v518_v37 = vmul.f32 %v765_v30, %v765_v30  ;;  %v445_v42 = vsel %vm427_vm1, %v765_v30, 0.0 }
  0xf1   :  { %v443_v38 = vsel %vm427_vm1, %v278_v33, 0.0  ;;  %v517_v39 = vmul.f32 %v278_v33, %v278_v33 }
  0xf2   :  { %v444_v40 = vadd.f32 %v443_v38, %v442_v34  ;;  %v561_v41 = vadd.f32 %v560_v36, %v559_v32  ;;  %v564_v52 = vsel %vm427_vm1, %v518_v37, 0.0 }
  0xf3   :  { %v562_v43 = vsel %vm427_vm1, %v517_v39, 0.0  ;;  %v768_v44 = vpop.f32.mrb[10].mxu0  ;;  %v1095_v46 = vpop.f32.mrb[10].mxu1 }
  0xf4   :  { %v563_v47 = vadd.f32 %v562_v43, %v561_v41  ;;  %v288_v48 = vpop.f32.mrb[11].mxu0  ;;  %v446_v50 = vadd.f32 %v445_v42, %v444_v40  ;;  %v1097_v51 = vpop.f32.mrb[11].mxu1  ;;  %v520_v53 = vmul.f32 %v768_v44, %v768_v44  ;;  %v449_v60 = vsel %vm427_vm1, %v768_v44, 0.0 }
  0xf5   :  { %v447_v54 = vsel %vm427_vm1, %v288_v48, 0.0  ;;  %v519_v55 = vmul.f32 %v288_v48, %v288_v48 }
  0xf6   :  { %v448_v57 = vadd.f32 %v447_v54, %v446_v50  ;;  %v565_v58 = vadd.f32 %v564_v52, %v563_v47  ;;  %v568_v5 = vsel %vm427_vm1, %v520_v53, 0.0  ;;  %v529_v54 = vmul.f32 %v1059_v49, %v1059_v49 }
  0xf7   :  { %v566_v61 = vsel %vm427_vm1, %v519_v55, 0.0  ;;  %v771_v62 = vpop.f32.mrb[12].mxu0  ;;  %v1103_v63 = vpop.f32.mrb[12].mxu1 }
  0xf8   :  { %v567_v0 = vadd.f32 %v566_v61, %v565_v58  ;;  %v298_v1 = vpop.f32.mrb[13].mxu0  ;;  %v450_v2 = vadd.f32 %v449_v60, %v448_v57  ;;  %v1105_v4 = vpop.f32.mrb[13].mxu1  ;;  %v522_v6 = vmul.f32 %v771_v62, %v771_v62  ;;  %v453_v12 = vsel %vm427_vm1, %v771_v62, 0.0 }
  0xf9   :  { %v451_v8 = vsel %vm427_vm1, %v298_v1, 0.0  ;;  %v521_v9 = vmul.f32 %v298_v1, %v298_v1 }
  0xfa   :  { %v452_v10 = vadd.f32 %v451_v8, %v450_v2  ;;  %v569_v11 = vadd.f32 %v568_v5, %v567_v0  ;;  %v572_v22 = vsel %vm427_vm1, %v522_v6, 0.0  ;;  %v467_v2 = vsel %vm427_vm1, %v1059_v49, 0.0 }
  0xfb   :  { %v570_v13 = vsel %vm427_vm1, %v521_v9, 0.0  ;;  %v774_v14 = vpop.f32.mrb[14].mxu0  ;;  %v1111_v15 = vpop.f32.mrb[14].mxu1  ;;  %v530_v9 = vmul.f32 %v1056_v45, %v1056_v45  ;;  %v471_v49 = vsel %vm427_vm1, %v1066_v59, 0.0 }
  0xfc   :  { %v571_v16 = vadd.f32 %v570_v13, %v569_v11  ;;  %v308_v18 = vpop.f32.mrb[15].mxu0  ;;  %v454_v19 = vadd.f32 %v453_v12, %v452_v10  ;;  %v1113_v20 = vpop.f32.mrb[15].mxu1  ;;  %v524_v23 = vmul.f32 %v774_v14, %v774_v14  ;;  %v457_v28 = vsel %vm427_vm1, %v774_v14, 0.0 }
  0xfd   :  { %v455_v24 = vsel %vm427_vm1, %v308_v18, 0.0  ;;  %v523_v25 = vmul.f32 %v308_v18, %v308_v18  ;;  %v586_v10 = vsel %vm427_vm1, %v529_v54, 0.0  ;;  %v531_v11 = vmul.f32 %v1066_v59, %v1066_v59 }
  0xfe   :  { %v456_v26 = vadd.f32 %v455_v24, %v454_v19  ;;  %v573_v27 = vadd.f32 %v572_v22, %v571_v16  ;;  %v576_v38 = vsel %vm427_vm1, %v524_v23, 0.0  ;;  %v469_v14 = vsel %vm427_vm1, %v1056_v45, 0.0 }
  0xff   :  { %v574_v29 = vsel %vm427_vm1, %v523_v25, 0.0  ;;  %v777_v30 = vpop.f32.mrb[16].mxu0  ;;  %v1119_v32 = vpop.f32.mrb[16].mxu1  ;;  %v588_v19 = vsel %vm427_vm1, %v530_v9, 0.0  ;;  %v532_v22 = vmul.f32 %v1064_v56, %v1064_v56  ;;  %v590_v23 = vsel %vm427_vm1, %v531_v11, 0.0 }
 0x100   :  { %v575_v33 = vadd.f32 %v574_v29, %v573_v27  ;;  %v318_v34 = vpop.f32.mrb[17].mxu0  ;;  %v458_v36 = vadd.f32 %v457_v28, %v456_v26  ;;  %v1121_v37 = vpop.f32.mrb[17].mxu1  ;;  %v526_v39 = vmul.f32 %v777_v30, %v777_v30  ;;  %v461_v44 = vsel %vm427_vm1, %v777_v30, 0.0 }
 0x101   :  { %v459_v40 = vsel %vm427_vm1, %v318_v34, 0.0  ;;  %v525_v41 = vmul.f32 %v318_v34, %v318_v34  ;;  %v533_v24 = vmul.f32 %v1073_v7, %v1073_v7  ;;  %v473_v45 = vsel %vm427_vm1, %v1064_v56, 0.0 }
 0x102   :  { %v460_v42 = vadd.f32 %v459_v40, %v458_v36  ;;  %v577_v43 = vadd.f32 %v576_v38, %v575_v33  ;;  %v580_v55 = vsel %vm427_vm1, %v526_v39, 0.0  ;;  %v475_v59 = vsel %vm427_vm1, %v1073_v7, 0.0 }
 0x103   :  { %v578_v47 = vsel %vm427_vm1, %v525_v41, 0.0  ;;  %v780_v48 = vpop.f32.mrb[18].mxu0  ;;  %v592_v29 = vsel %vm427_vm1, %v532_v22, 0.0  ;;  %v534_v30 = vmul.f32 %v1071_v3, %v1071_v3  ;;  %v594_v33 = vsel %vm427_vm1, %v533_v24, 0.0 }
 0x104   :  { %v579_v50 = vadd.f32 %v578_v47, %v577_v43  ;;  %v328_v52 = vpop.f32.mrb[19].mxu0  ;;  %v462_v53 = vadd.f32 %v461_v44, %v460_v42  ;;  %v528_v57 = vmul.f32 %v780_v48, %v780_v48  ;;  %v465_v0 = vsel %vm427_vm1, %v780_v48, 0.0 }
 0x105   :  { %v463_v58 = vsel %vm427_vm1, %v328_v52, 0.0  ;;  %v527_v60 = vmul.f32 %v328_v52, %v328_v52  ;;  %v535_v34 = vmul.f32 %v1081_v21, %v1081_v21  ;;  %v477_v56 = vsel %vm427_vm1, %v1071_v3, 0.0 }
 0x106   :  { %v464_v61 = vadd.f32 %v463_v58, %v462_v53  ;;  %v581_v62 = vadd.f32 %v580_v55, %v579_v50  ;;  %v584_v8 = vsel %vm427_vm1, %v528_v57, 0.0  ;;  %v479_v7 = vsel %vm427_vm1, %v1081_v21, 0.0 }
 0x107   :  { %v582_v1 = vsel %vm427_vm1, %v527_v60, 0.0  ;;  %v596_v41 = vsel %vm427_vm1, %v534_v30, 0.0  ;;  %v536_v42 = vmul.f32 %v1079_v17, %v1079_v17  ;;  %v598_v43 = vsel %vm427_vm1, %v535_v34, 0.0 }
 0x108   :  { %v466_v5 = vadd.f32 %v465_v0, %v464_v61  ;;  %v583_v6 = vadd.f32 %v582_v1, %v581_v62  ;;  %v537_v44 = vmul.f32 %v1089_v35, %v1089_v35  ;;  %v481_v3 = vsel %vm427_vm1, %v1079_v17, 0.0 }
 0x109   :  { %v483_v21 = vsel %vm427_vm1, %v1089_v35, 0.0  ;;  %v600_v53 = vsel %vm427_vm1, %v536_v42, 0.0  ;;  %v538_v54 = vmul.f32 %v1087_v31, %v1087_v31  ;;  %v539_v57 = vmul.f32 %v1097_v51, %v1097_v51 }
 0x10a   :  { %v585_v12 = vadd.f32 %v584_v8, %v583_v6  ;;  %v468_v13 = vadd.f32 %v467_v2, %v466_v5  ;;  %v602_v55 = vsel %vm427_vm1, %v537_v44, 0.0  ;;  %v485_v17 = vsel %vm427_vm1, %v1087_v31, 0.0 }
 0x10b   :  { %v487_v35 = vsel %vm427_vm1, %v1097_v51, 0.0  ;;  %v604_v0 = vsel %vm427_vm1, %v538_v54, 0.0  ;;  %v540_v1 = vmul.f32 %v1095_v46, %v1095_v46  ;;  %v606_v2 = vsel %vm427_vm1, %v539_v57, 0.0 }
 0x10c   :  { %v587_v16 = vadd.f32 %v586_v10, %v585_v12  ;;  %v470_v18 = vadd.f32 %v469_v14, %v468_v13  ;;  %v541_v5 = vmul.f32 %v1105_v4, %v1105_v4  ;;  %v489_v31 = vsel %vm427_vm1, %v1095_v46, 0.0 }
 0x10d   :  { %v491_v51 = vsel %vm427_vm1, %v1105_v4, 0.0  ;;  %v608_v11 = vsel %vm427_vm1, %v540_v1, 0.0  ;;  %v542_v12 = vmul.f32 %v1103_v63, %v1103_v63  ;;  %v543_v14 = vmul.f32 %v1113_v20, %v1113_v20 }
 0x10e   :  { %v472_v25 = vadd.f32 %v471_v49, %v470_v18  ;;  %v589_v26 = vadd.f32 %v588_v19, %v587_v16  ;;  %v610_v13 = vsel %vm427_vm1, %v541_v5, 0.0  ;;  %v493_v46 = vsel %vm427_vm1, %v1103_v63, 0.0 }
 0x10f   :  { %v495_v4 = vsel %vm427_vm1, %v1113_v20, 0.0  ;;  %v612_v22 = vsel %vm427_vm1, %v542_v12, 0.0  ;;  %v614_v24 = vsel %vm427_vm1, %v543_v14, 0.0  ;;  %v497_v63 = vsel %vm427_vm1, %v1111_v15, 0.0 }
 0x110   :  { %v591_v27 = vadd.f32 %v590_v23, %v589_v26  ;;  %v474_v28 = vadd.f32 %v473_v45, %v472_v25  ;;  %v544_v23 = vmul.f32 %v1111_v15, %v1111_v15  ;;  %v545_v25 = vmul.f32 %v1121_v37, %v1121_v37 }
 0x111   :  { %v499_v20 = vsel %vm427_vm1, %v1121_v37, 0.0 }
 0x112   :  { %v476_v36 = vadd.f32 %v475_v59, %v474_v28  ;;  %v593_v38 = vadd.f32 %v592_v29, %v591_v27  ;;  %v616_v28 = vsel %vm427_vm1, %v544_v23, 0.0  ;;  %v546_v29 = vmul.f32 %v1119_v32, %v1119_v32 }
 0x113   :  { %v618_v30 = vsel %vm427_vm1, %v545_v25, 0.0 }
 0x114   :  { %v595_v39 = vadd.f32 %v594_v33, %v593_v38  ;;  %v478_v40 = vadd.f32 %v477_v56, %v476_v36  ;;  %v501_v36 = vsel %vm427_vm1, %v1119_v32, 0.0  ;;  %v620_v15 = vsel %vm427_vm1, %v546_v29, 0.0 }
 0x116   :  { %v480_v47 = vadd.f32 %v479_v7, %v478_v40  ;;  %v597_v48 = vadd.f32 %v596_v41, %v595_v39  ;;  %v628_v39 = vlaneseq }
 0x118   :  { %v599_v50 = vadd.f32 %v598_v43, %v597_v48  ;;  %v482_v52 = vadd.f32 %v481_v3, %v480_v47  ;;  %v629_v44 = vshrl.u32 %v628_v39, 7 }
 0x11a   :  { %v484_v58 = vadd.f32 %v483_v21, %v482_v52  ;;  %v601_v60 = vadd.f32 %v600_v53, %v599_v50  ;;  %vm630_vm2 = vcmp.eq.s32.totalorder %v629_v44, 0 }
 0x11c   :  { %v603_v61 = vadd.f32 %v602_v55, %v601_v60  ;;  %v486_v62 = vadd.f32 %v485_v17, %v484_v58 }
 0x11e   :  { %v488_v6 = vadd.f32 %v487_v35, %v486_v62  ;;  %v605_v8 = vadd.f32 %v604_v0, %v603_v61 }
 0x120   :  { %v607_v9 = vadd.f32 %v606_v2, %v605_v8  ;;  %v490_v10 = vadd.f32 %v489_v31, %v488_v6 }
 0x122   :  { %v492_v49 = vadd.f32 %v491_v51, %v490_v10  ;;  %v609_v16 = vadd.f32 %v608_v11, %v607_v9 }
 0x124   :  { %v611_v18 = vadd.f32 %v610_v13, %v609_v16  ;;  %v494_v19 = vadd.f32 %v493_v46, %v492_v49 }
 0x126   :  { %v496_v26 = vadd.f32 %v495_v4, %v494_v19  ;;  %v613_v45 = vadd.f32 %v612_v22, %v611_v18 }
 0x128   :  { %v615_v59 = vadd.f32 %v614_v24, %v613_v45  ;;  %v498_v27 = vadd.f32 %v497_v63, %v496_v26 }
 0x12a   :  { %v500_v33 = vadd.f32 %v499_v20, %v498_v27  ;;  %v617_v34 = vadd.f32 %v616_v28, %v615_v59 }
 0x12c   :  { %v502_v38 = vadd.f32 %v501_v36, %v500_v33  ;;  %v619_v56 = vadd.f32 %v618_v30, %v617_v34 }
 0x12e   :  { %v503_v7 = vrot.slane %v502_v38, 4  ;;  %v621_v37 = vadd.f32 %v620_v15, %v619_v56 }
 0x130   :  { %v504_v40 = vadd.f32 %v503_v7, %v502_v38  ;;  %v622_v41 = vrot.slane %v621_v37, 4 }
 0x132   :  { %v623_v42 = vadd.f32 %v622_v41, %v621_v37  ;;  %v505_v43 = vrot.slane %v504_v40, 2 }
 0x134   :  { %v506_v47 = vadd.f32 %v505_v43, %v504_v40  ;;  %v624_v48 = vrot.slane %v623_v42, 2 }
 0x136   :  { %v507_v3 = vrot.slane %v506_v47, 1  ;;  %v625_v21 = vadd.f32 %v624_v48, %v623_v42 }
 0x138   :  { %v508_v32 = vadd.f32 %v507_v3, %v506_v47  ;;  %v626_v50 = vrot.slane %v625_v21, 1 }
 0x13a   :  { %v631_v52 = vsel %vm630_vm2, %v508_v32, 0.0  ;;  %v627_v53 = vadd.f32 %v626_v50, %v625_v21 }
 0x13b   :  { %632 = vst.msk [vmem:[#allocation2] sm:$0xff] %vm427_vm1, %v631_v52 }
 0x13c   :  { %833 = shalt.err (!%p830_p4)
}
 0x13d   :  { %s834_s18 = scalar_lea.hbm %s1252_s2, 128 }
 0x13e   :  { %p835_p5 = scmp.ne.s32.totalorder %s1252_s2, %s834_s18  ;;  %p838_p6 = scmp.lt.u32.totalorder %s834_s18, %s1252_s2 }
 0x140   :  { %p840_p7 = pnand %p838_p6, %p835_p5 }
 0x142   :  { %843 = shalt.err (!%p840_p7)
}
 0x143   :  { %644 = dma.vmem_to_hbm [thread:$0]  %s642_s12, 128, %s1252_s2, [#allocation3]   ;;  %v633_v54 = vsel %vm630_vm2, %v627_v53, 0.0 }
 0x144   :  { %634 = vst.msk [vmem:[#allocation4] sm:$0xff] %vm427_vm1, %v633_v54  ;;  %s844_s24 = scalar_lea.vmem %s652_s14, 128  ;;  %p849_p9 = scmp.lt.s32.totalorder %s652_s14, %s652_s14 }
 0x145   :  { %p845_p8 = scmp.ne.s32.totalorder %s652_s14, %s844_s24  ;;  %p850_p10 = scmp.lt.s32.totalorder %s844_s24, %s844_s24 }
 0x147   :  { %p851_p11 = por %p850_p10, %p849_p9 }
 0x149   :  { %p852_p12 = pnand %p851_p11, %p845_p8 }
 0x14b   :  { %855 = shalt.err (!%p852_p12)
}
 0x14c   :  { %s856_s27 = scalar_lea.hbm %s1253_s3, 128 }
 0x14d   :  { %p857_p13 = scmp.ne.s32.totalorder %s1253_s3, %s856_s27  ;;  %p860_p0 = scmp.lt.u32.totalorder %s856_s27, %s1253_s3 }
 0x14f   :  { %p862_p1 = pnand %p860_p0, %p857_p13 }
 0x151   :  { %865 = shalt.err (!%p862_p1)
}
 0x152   :  { %654 = dma.vmem_to_hbm [thread:$0]  %s652_s14, 128, %s1253_s3, [#allocation5]  }
 0x153   :  { %866 = dma.done.wait [#allocation3], 128  }
 0x154   :  { %867 = vsyncadd [#allocation3], 4294967168 }
 0x155   :  { %868 = dma.done.wait [#allocation5], 128  }
 0x156   :  { %869 = vsyncadd [#allocation5], 4294967168 }
 0x157   :  { %661 = vsyncpa [#allocation3], 1 }
 0x158   :  { %662 = vsyncpa [#allocation5], 1 }

</bundles_post_ra>
